<compile_context>
chip_gen: v5e
topology: v5e:2x2
jax: 0.10.0
libtpu: 0.0.40
codegen_flags: <defaults>
</compile_context>

<pallas_src>
import functools
import math

import jax
import jax.numpy as jnp
from jax.experimental import pallas as pl
from jax.experimental.pallas import tpu as pltpu


# ---------------------------------------------------------------------------
# Kernel
# ---------------------------------------------------------------------------
def _attnet_kernel(*refs, block_b, block_q, seq, hidden, scale, has_mask,
                   return_attn):
    n_in = 7 + int(has_mask)
    n_out = 1 + int(return_attn)
    in_refs = refs[:n_in]
    out_refs = refs[n_in:n_in + n_out]
    kbuf_ref, vbuf_ref = refs[n_in + n_out:]

    it = iter(in_refs)
    x_ref = next(it)                                  # (block_b, S, H)   f32
    mask_ref = next(it) if has_mask else None         # (block_b, bq, 1)  f32
    wq_ref = next(it)                                 # (H, 2H)           bf16
    wkv_ref = next(it)                                # (H, 3H) = Wk|Wv   bf16
    w1_ref = next(it)                                 # (H, H)            bf16
    b1_ref = next(it)                                 # (1, H)            f32
    w2_ref = next(it)                                 # (H, H)            bf16
    b2_ref = next(it)                                 # (1, H)            f32

    out_ref = out_refs[0]                             # (block_b, bq, H)
    attn_ref = out_refs[1] if return_attn else None   # (block_b, bq, S)

    f32, bf16 = jnp.float32, jnp.bfloat16
    qi = pl.program_id(1)

    # ---- once per batch tile: K / V projections over all S key rows --------
    @pl.when(qi == 0)
    def _():
        x_all = x_ref[...]                                        # (block_b, S, H)
        # S is chosen a multiple of 8 (or == full dim), so this reshape is a
        # layout no-op for the common case.
        x2d = x_all.reshape(block_b * seq, hidden).astype(bf16)
        kv = jnp.dot(x2d, wkv_ref[...], preferred_element_type=f32)   # (rows, 3H)
        kp = kv[:, : 2 * hidden]
        vp = kv[:, 2 * hidden:]
        kbuf_ref[...] = kp.reshape(block_b, seq, 2 * hidden).astype(bf16)
        vbuf_ref[...] = vp.reshape(block_b, seq, hidden).astype(bf16)

    # ---- per query tile -----------------------------------------------------
    if block_q == seq:
        x_q = x_ref[...]                                          # residual, f32
    else:
        q0 = pl.multiple_of(qi * block_q, block_q)
        x_q = x_ref[:, pl.ds(q0, block_q), :]

    xq2d = x_q.reshape(block_b * block_q, hidden).astype(bf16)
    qp = jnp.dot(xq2d, wq_ref[...], preferred_element_type=f32) * scale
    q3 = qp.reshape(block_b, block_q, 2 * hidden)
    if has_mask:
        # Per-query multiplicative mask folded into q:
        # (m_i * q_i) . k_j == m_i * (q_i . k_j)  -> O(rows*2H) instead of O(S*S).
        q3 = q3 * mask_ref[...]
    q3 = q3.astype(bf16)

    # scores = q @ k^T, contraction over the feature dim (flash-style einsum).
    scores = jnp.einsum("bqe,bke->bqk", q3, kbuf_ref[...],
                        preferred_element_type=f32)               # (block_b, bq, S)

    # Numerically stable softmax in f32; reciprocal goes to the EUP slot.
    m = jnp.max(scores, axis=-1, keepdims=True)
    e = jnp.exp(scores - m)
    attn = e * pl.reciprocal(jnp.sum(e, axis=-1, keepdims=True), approx=True)
    if return_attn:
        attn_ref[...] = attn.astype(attn_ref.dtype)

    # Dropout is identity in eval mode.
    # TODO(synk): training-mode dropout via pltpu.prng_seed / prng_random_bits.

    h = jnp.einsum("bqk,bkd->bqd", attn.astype(bf16), vbuf_ref[...],
                   preferred_element_type=f32)                    # (block_b, bq, H)
    h2 = h.reshape(block_b * block_q, hidden)
    h2 = jnp.dot(h2.astype(bf16), w1_ref[...], preferred_element_type=f32) + b1_ref[...]
    h2 = jnp.maximum(h2, 0.0)
    h2 = jnp.dot(h2.astype(bf16), w2_ref[...], preferred_element_type=f32) + b2_ref[...]

    out_ref[...] = (h2.reshape(block_b, block_q, hidden) + x_q).astype(out_ref.dtype)


# ---------------------------------------------------------------------------
# Parameter prep / tiling heuristics
# ---------------------------------------------------------------------------
def _prepare_params(params, hidden):
    """params in (in, out) layout (transpose of nn.Linear.weight). Weights ->
    bf16 (MXU operands), biases -> f32 (added to the f32 accumulator).
    Wk|Wv are fused into a single (H, 3H) matrix."""
    wq_t, wk_t, wv_t, w1_t, b1, w2_t, b2 = params
    bf16 = jnp.bfloat16
    wq = wq_t.astype(bf16)
    wkv = jnp.concatenate([wk_t, wv_t], axis=1).astype(bf16)      # (H, 3H)
    w1 = w1_t.astype(bf16)
    w2 = w2_t.astype(bf16)
    b1 = b1.reshape(1, hidden).astype(jnp.float32)
    b2 = b2.reshape(1, hidden).astype(jnp.float32)
    return wq, wkv, w1, b1, w2, b2


def _pick_block_b(batch, seq, target_rows=512):
    """Largest divisor of batch with block_b*seq <= target_rows, while keeping
    >= 2 batch tiles when possible (so the 'parallel' axis feeds 2 TCs)."""
    cap = max(1, target_rows // max(seq, 1))
    if batch >= 2:
        cap = min(cap, batch // 2)
    cap = max(1, min(cap, batch))
    best = 1
    for d in range(1, cap + 1):
        if batch % d == 0:
            best = d
    return best


def _pick_block_q(seq, max_q=256):
    """Query-tile size: full seq if small, else the largest divisor <= max_q
    that keeps the sublane packing (multiple of 8)."""
    if seq <= max_q:
        return seq
    for d in range(max_q, 0, -1):
        if seq % d == 0 and d % 8 == 0:
            return d
    return seq


def _estimate_vmem_bytes(block_b, block_q, seq, hidden, has_mask, attn_bytes):
    f32b, bf16b = 4, 2
    x_blk = 2 * block_b * seq * hidden * f32b                       # 2x buffered
    mask_blk = (2 * block_b * block_q * f32b) if has_mask else 0
    weights = bf16b * (hidden * 2 * hidden + hidden * 3 * hidden
                       + 2 * hidden * hidden) + f32b * 2 * hidden   # 1x buffered
    out_blk = 2 * block_b * block_q * hidden * f32b
    attn_blk = 2 * block_b * block_q * seq * attn_bytes
    kv_scratch = bf16b * block_b * seq * 3 * hidden
    live = f32b * (block_b * seq * 3 * hidden                       # kv proj acc
                   + 3 * block_b * block_q * seq                    # scores/e/attn
                   + 2 * block_b * block_q * 2 * hidden)            # q proj + temps
    return x_blk + mask_blk + weights + out_blk + attn_blk + kv_scratch + live


def _vmem_limit_bytes(working_set):
    try:
        cap = int(pltpu.get_tpu_info().vmem_capacity_bytes)
    except Exception:  # pragma: no cover
        cap = 64 * 1024 * 1024          # conservative: v7x per-core physical VMEM
    limit = max(2 * working_set + (8 << 20), 32 << 20)
    return int(min(limit, int(cap * 0.6)))


# ---------------------------------------------------------------------------
# Wrapper
# ---------------------------------------------------------------------------
def attnet_forward(x, params, mask=None, *, block_b=None, block_q=None,
                   return_attn=True, attn_dtype=jnp.float32, target_rows=512):
    """x: (B, S, H) float32.  mask: optional (B, S).  Returns (out, attn|None)."""
    B, S, H = x.shape
    wq, wkv, w1, b1, w2, b2 = _prepare_params(params, H)
    scale = 1.0 / math.sqrt(H)

    if block_b is None:
        block_b = _pick_block_b(B, S, target_rows)
    if block_q is None:
        block_q = _pick_block_q(S)
    assert B % block_b == 0, "block_b must divide batch"
    assert S % block_q == 0, "block_q must divide seq"

    grid = (B // block_b, S // block_q)
    has_mask = mask is not None

    inputs = [x]
    if has_mask:
        inputs.append(mask.reshape(B, S, 1).astype(jnp.float32))
    inputs += [wq, wkv, w1, b1, w2, b2]

    kernel = functools.partial(
        _attnet_kernel, block_b=block_b, block_q=block_q, seq=S, hidden=H,
        scale=scale, has_mask=has_mask, return_attn=return_attn)

    out_shape = [jax.ShapeDtypeStruct((B, S, H), jnp.float32)]
    if return_attn:
        out_shape.append(jax.ShapeDtypeStruct((B, S, S), attn_dtype))

    attn_bytes = jnp.dtype(attn_dtype).itemsize if return_attn else 0
    working_set = _estimate_vmem_bytes(block_b, block_q, S, H, has_mask, attn_bytes)
    vmem_limit = _vmem_limit_bytes(working_set)

    # Advisory cost estimate so XLA can schedule around the custom call.
    flops = int(2 * B * S * H * 7 * H + 2 * B * S * S * 3 * H)
    transcendentals = int(B * S * S + B * S)
    bytes_accessed = int(
        4 * B * S * H + 4 * B * S * H + attn_bytes * B * S * S
        + (4 * B * S if has_mask else 0)
        + 2 * (H * 2 * H + H * 3 * H + 2 * H * H) + 4 * 2 * H)

    def _run(single_buffer_weights):
        def const_spec(shape):
            nd = len(shape)
            idx = lambda b, q, _nd=nd: (0,) * _nd
            if single_buffer_weights:
                # Grid-invariant weights: one VMEM copy instead of the default
                # double buffer — pure VMEM headroom (critical on v7x / 64 MiB).
                return pl.BlockSpec(shape, idx, pipeline_mode=pl.Buffered(1))
            return pl.BlockSpec(shape, idx)

        in_specs = [pl.BlockSpec((block_b, S, H), lambda b, q: (b, 0, 0))]
        if has_mask:
            in_specs.append(
                pl.BlockSpec((block_b, block_q, 1), lambda b, q: (b, q, 0)))
        in_specs += [
            const_spec((H, 2 * H)),     # Wq^T           (bf16)
            const_spec((H, 3 * H)),     # Wk^T | Wv^T    (bf16)
            const_spec((H, H)),         # W1^T           (bf16)
            const_spec((1, H)),         # b1             (f32)
            const_spec((H, H)),         # W2^T           (bf16)
            const_spec((1, H)),         # b2             (f32)
        ]

        out_specs = [pl.BlockSpec((block_b, block_q, H), lambda b, q: (b, q, 0))]
        if return_attn:
            out_specs.append(
                pl.BlockSpec((block_b, block_q, S), lambda b, q: (b, q, 0)))

        return pl.pallas_call(
            kernel,
            out_shape=out_shape,
            grid_spec=pltpu.PrefetchScalarGridSpec(
                num_scalar_prefetch=0,
                grid=grid,
                in_specs=in_specs,
                out_specs=out_specs,
                scratch_shapes=[
                    pltpu.VMEM((block_b, S, 2 * H), jnp.bfloat16),  # K proj tile
                    pltpu.VMEM((block_b, S, H), jnp.bfloat16),      # V proj tile
                ],
            ),
            compiler_params=pltpu.CompilerParams(
                dimension_semantics=("parallel", "arbitrary"),
                vmem_limit_bytes=vmem_limit,
            ),
            cost_estimate=pl.CostEstimate(
                flops=flops, transcendentals=transcendentals,
                bytes_accessed=bytes_accessed),
        )(*inputs)

    try:
        outs = _run(True)
    except Exception:  # pragma: no cover — Pallas version without Buffered(1)
        outs = _run(False)

    out = outs[0]
    attn = outs[1] if return_attn else None
    return out, attn


# ---------------------------------------------------------------------------
# Params + pure-JAX reference (faithful to the PyTorch module, all f32)
# ---------------------------------------------------------------------------
def init_params(key, hidden):
    """Deterministic synthetic params; shapes match attnet.__init__.
    nn.Linear(in, out).weight is (out, in); we store the transpose (in, out)."""
    ks = jax.random.split(key, 7)
    s = 1.0 / math.sqrt(hidden)
    u = lambda k, shp: jax.random.uniform(k, shp, jnp.float32, -s, s)
    wq_t = u(ks[0], (hidden, 2 * hidden))
    wk_t = u(ks[1], (hidden, 2 * hidden))
    wv_t = u(ks[2], (hidden, hidden))
    w1_t = u(ks[3], (hidden, hidden))
    b1 = u(ks[4], (hidden,))
    w2_t = u(ks[5], (hidden, hidden))
    b2 = u(ks[6], (hidden,))
    return (wq_t, wk_t, wv_t, w1_t, b1, w2_t, b2)


def attnet_reference(x, params, mask=None):
    """Full-f32 reference mirroring the PyTorch forward (dropout = identity)."""
    B, S, H = x.shape
    wq_t, wk_t, wv_t, w1_t, b1, w2_t, b2 = params
    q = jnp.einsum("bsh,he->bse", x, wq_t)
    k = jnp.einsum("bsh,he->bse", x, wk_t)
    v = jnp.einsum("bsh,hd->bsd", x, wv_t)
    attn = jnp.einsum("bqe,bke->bqk", q / math.sqrt(H), k)
    if mask is not None:
        attn = attn * mask.reshape(B, S, 1).astype(jnp.float32)
    attn = jax.nn.softmax(attn, axis=-1)
    h = jnp.einsum("bqk,bkd->bqd", attn, v)
    h = jnp.einsum("bsh,hd->bsd", h, w1_t) + b1
    h = jax.nn.relu(h)
    h = jnp.einsum("bsh,hd->bsd", h, w2_t) + b2
    return h + x, attn


# ---------------------------------------------------------------------------
# Main
# ---------------------------------------------------------------------------
if __name__ == "__main__":
    B, S, H = 2, 8, 32
    key = jax.random.PRNGKey(0)
    kx, km, kparam = jax.random.split(key, 3)

    x = jax.random.normal(kx, (B, S, H), jnp.float32)
    mask = (jax.random.uniform(km, (B, S)) > 0.2).astype(jnp.float32)
    params = init_params(kparam, H)

    ref_out, ref_attn = attnet_reference(x, params, mask)
    ref_out_nm, ref_attn_nm = attnet_reference(x, params, None)

    # Masked path (returns attention).
    out, attn = attnet_forward(x, params, mask)
    out, attn = jax.block_until_ready((out, attn))
    assert out.shape == (B, S, H) and attn.shape == (B, S, S)
    assert jnp.allclose(out, ref_out, atol=5e-2, rtol=5e-2)
    assert jnp.allclose(attn, ref_attn, atol=2e-2, rtol=2e-2)

    # Specialized no-mask path (no mask operand, no extra multiply).
    out2, attn2 = attnet_forward(x, params, None)
    out2, attn2 = jax.block_until_ready((out2, attn2))
    assert jnp.allclose(out2, ref_out_nm, atol=5e-2, rtol=5e-2)
    assert jnp.allclose(attn2, ref_attn_nm, atol=2e-2, rtol=2e-2)

    # Out-only specialization: the O(B*S^2) attention store is skipped.
    out3, none_attn = attnet_forward(x, params, mask, return_attn=False)
    out3 = jax.block_until_ready(out3)
    assert none_attn is None
    assert jnp.allclose(out3, ref_out, atol=5e-2, rtol=5e-2)

    print("KERNEL_OK")
</pallas_src>

<mosaic_0001>
module attributes {stable_mosaic.version = 11 : i64} {
  func.func @_attnet_kernel(%arg0: i32, %arg1: i32, %arg2: memref<1x8x32xf32, #tpu.memory_space<vmem>>, %arg3: memref<1x8x1xf32, #tpu.memory_space<vmem>>, %arg4: memref<32x64xbf16, #tpu.memory_space<vmem>>, %arg5: memref<32x96xbf16, #tpu.memory_space<vmem>>, %arg6: memref<32x32xbf16, #tpu.memory_space<vmem>>, %arg7: memref<1x32xf32, #tpu.memory_space<vmem>>, %arg8: memref<32x32xbf16, #tpu.memory_space<vmem>>, %arg9: memref<1x32xf32, #tpu.memory_space<vmem>>, %arg10: memref<1x8x32xf32, #tpu.memory_space<vmem>>, %arg11: memref<1x8x8xf32, #tpu.memory_space<vmem>>, %arg12: memref<1x8x64xbf16, #tpu.memory_space<vmem>>, %arg13: memref<1x8x32xbf16, #tpu.memory_space<vmem>>) attributes {dimension_semantics = [#tpu.dimension_semantics<parallel>, #tpu.dimension_semantics<arbitrary>], iteration_bounds = array<i64: 2, 1>, scalar_prefetch = 0 : i64, scratch_operands = 2 : i64, tpu.core_type = #tpu.core_type<tc>, window_params = [{transform_indices = @transform_0, window_bounds = array<i64: 1, 8, 32>}, {transform_indices = @transform_1, window_bounds = array<i64: 1, 8, 1>}, {pipeline_mode = #tpu.pipeline_mode<synchronous>, transform_indices = @transform_2, window_bounds = array<i64: 32, 64>}, {pipeline_mode = #tpu.pipeline_mode<synchronous>, transform_indices = @transform_3, window_bounds = array<i64: 32, 96>}, {pipeline_mode = #tpu.pipeline_mode<synchronous>, transform_indices = @transform_4, window_bounds = array<i64: 32, 32>}, {pipeline_mode = #tpu.pipeline_mode<synchronous>, transform_indices = @transform_5, window_bounds = array<i64: 1, 32>}, {pipeline_mode = #tpu.pipeline_mode<synchronous>, transform_indices = @transform_6, window_bounds = array<i64: 32, 32>}, {pipeline_mode = #tpu.pipeline_mode<synchronous>, transform_indices = @transform_7, window_bounds = array<i64: 1, 32>}, {transform_indices = @transform_8, window_bounds = array<i64: 1, 8, 32>}, {transform_indices = @transform_9, window_bounds = array<i64: 1, 8, 8>}]} {
    %c0_i32 = arith.constant 0 : i32
    %0 = arith.cmpi eq, %arg1, %c0_i32 : i32
    %1 = arith.extui %0 : i1 to i32
    %c0_i32_0 = arith.constant 0 : i32
    %2 = arith.cmpi ne, %1, %c0_i32_0 : i32
    scf.if %2 {
      %c0_36 = arith.constant 0 : index
      %c0_37 = arith.constant 0 : index
      %c0_38 = arith.constant 0 : index
      %49 = vector.load %arg2[%c0_36, %c0_37, %c0_38] : memref<1x8x32xf32, #tpu.memory_space<vmem>>, vector<1x8x32xf32>
      %50 = vector.shape_cast %49 : vector<1x8x32xf32> to vector<8x32xf32>
      %51 = arith.truncf %50 : vector<8x32xf32> to vector<8x32xbf16>
      %c0_39 = arith.constant 0 : index
      %c0_40 = arith.constant 0 : index
      %52 = vector.load %arg5[%c0_39, %c0_40] : memref<32x96xbf16, #tpu.memory_space<vmem>>, vector<32x96xbf16>
      %cst_41 = arith.constant dense<0.000000e+00> : vector<8x96xf32>
      %53 = tpu.matmul %51, %52, %cst_41 {dimension_numbers = #tpu.dot_dimension_numbers<[1], [0], [0], [1], [0, 0, 1, 1], [], []>} : vector<8x32xbf16>, vector<32x96xbf16>, vector<8x96xf32> -> vector<8x96xf32>
      %54 = vector.extract_strided_slice %53 {offsets = [0, 0], sizes = [8, 64], strides = [1, 1]} : vector<8x96xf32> to vector<8x64xf32>
      %55 = vector.extract_strided_slice %53 {offsets = [0, 64], sizes = [8, 32], strides = [1, 1]} : vector<8x96xf32> to vector<8x32xf32>
      %56 = vector.shape_cast %54 : vector<8x64xf32> to vector<1x8x64xf32>
      %57 = arith.truncf %56 : vector<1x8x64xf32> to vector<1x8x64xbf16>
      %c0_42 = arith.constant 0 : index
      %c0_43 = arith.constant 0 : index
      %c0_44 = arith.constant 0 : index
      %58 = vector.load %arg12[%c0_42, %c0_43, %c0_44] : memref<1x8x64xbf16, #tpu.memory_space<vmem>>, vector<1x8x64xbf16>
      tpu.vector_store %arg12[%c0_42, %c0_43, %c0_44], %57 {strides = array<i32>} : memref<1x8x64xbf16, #tpu.memory_space<vmem>>, vector<1x8x64xbf16>,
      %59 = vector.shape_cast %55 : vector<8x32xf32> to vector<1x8x32xf32>
      %60 = arith.truncf %59 : vector<1x8x32xf32> to vector<1x8x32xbf16>
      %c0_45 = arith.constant 0 : index
      %c0_46 = arith.constant 0 : index
      %c0_47 = arith.constant 0 : index
      %61 = vector.load %arg13[%c0_45, %c0_46, %c0_47] : memref<1x8x32xbf16, #tpu.memory_space<vmem>>, vector<1x8x32xbf16>
      tpu.vector_store %arg13[%c0_45, %c0_46, %c0_47], %60 {strides = array<i32>} : memref<1x8x32xbf16, #tpu.memory_space<vmem>>, vector<1x8x32xbf16>,
    } else {
    }
    %c0 = arith.constant 0 : index
    %c0_1 = arith.constant 0 : index
    %c0_2 = arith.constant 0 : index
    %3 = vector.load %arg2[%c0, %c0_1, %c0_2] : memref<1x8x32xf32, #tpu.memory_space<vmem>>, vector<1x8x32xf32>
    %4 = vector.shape_cast %3 : vector<1x8x32xf32> to vector<8x32xf32>
    %5 = arith.truncf %4 : vector<8x32xf32> to vector<8x32xbf16>
    %c0_3 = arith.constant 0 : index
    %c0_4 = arith.constant 0 : index
    %6 = vector.load %arg4[%c0_3, %c0_4] : memref<32x64xbf16, #tpu.memory_space<vmem>>, vector<32x64xbf16>
    %cst = arith.constant dense<0.000000e+00> : vector<8x64xf32>
    %7 = tpu.matmul %5, %6, %cst {dimension_numbers = #tpu.dot_dimension_numbers<[1], [0], [0], [1], [0, 0, 1, 1], [], []>} : vector<8x32xbf16>, vector<32x64xbf16>, vector<8x64xf32> -> vector<8x64xf32>
    %cst_5 = arith.constant 0.176776692 : f32
    %8 = vector.broadcast %cst_5 : f32 to vector<8x64xf32>
    %9 = arith.mulf %7, %8 : vector<8x64xf32>
    %10 = vector.shape_cast %9 : vector<8x64xf32> to vector<1x8x64xf32>
    %c0_6 = arith.constant 0 : index
    %c0_7 = arith.constant 0 : index
    %c0_8 = arith.constant 0 : index
    %11 = vector.load %arg3[%c0_6, %c0_7, %c0_8] : memref<1x8x1xf32, #tpu.memory_space<vmem>>, vector<1x8x1xf32>
    %12 = vector.broadcast %11 : vector<1x8x1xf32> to vector<1x8x64xf32>
    %13 = arith.mulf %10, %12 : vector<1x8x64xf32>
    %14 = arith.truncf %13 : vector<1x8x64xf32> to vector<1x8x64xbf16>
    %c0_9 = arith.constant 0 : index
    %c0_10 = arith.constant 0 : index
    %c0_11 = arith.constant 0 : index
    %15 = vector.load %arg12[%c0_9, %c0_10, %c0_11] : memref<1x8x64xbf16, #tpu.memory_space<vmem>>, vector<1x8x64xbf16>
    "tpu.trace_start"() <{level = 10 : i32, message = "bqe,bke->bqk"}> : () -> ()
    %cst_12 = arith.constant dense<0.000000e+00> : vector<1x8x8xf32>
    %16 = tpu.matmul %14, %15, %cst_12 {dimension_numbers = #tpu.dot_dimension_numbers<[2], [2], [1], [1], [0, 0, 0, 1, 1, 1], [0], [0]>} : vector<1x8x64xbf16>, vector<1x8x64xbf16>, vector<1x8x8xf32> -> vector<1x8x8xf32>
    "tpu.trace_stop"() : () -> ()
    %cst_13 = arith.constant dense<0xFF800000> : vector<1x8xf32>
    %17 = vector.multi_reduction <maximumf>, %16, %cst_13 [2] : vector<1x8x8xf32> to vector<1x8xf32>
    %18 = vector.shape_cast %17 : vector<1x8xf32> to vector<1x8x1xf32>
    %19 = vector.broadcast %18 : vector<1x8x1xf32> to vector<1x8x8xf32>
    %20 = arith.subf %16, %19 : vector<1x8x8xf32>
    %21 = math.exp %20 : vector<1x8x8xf32>
    %cst_14 = arith.constant dense<0.000000e+00> : vector<1x8xf32>
    %22 = vector.multi_reduction <add>, %21, %cst_14 [2] : vector<1x8x8xf32> to vector<1x8xf32>
    %23 = vector.shape_cast %22 : vector<1x8xf32> to vector<1x8x1xf32>
    %24 = tpu.reciprocal %23 {approx = true} : vector<1x8x1xf32> -> vector<1x8x1xf32>
    %25 = vector.broadcast %24 : vector<1x8x1xf32> to vector<1x8x8xf32>
    %26 = arith.mulf %21, %25 : vector<1x8x8xf32>
    %c0_15 = arith.constant 0 : index
    %c0_16 = arith.constant 0 : index
    %c0_17 = arith.constant 0 : index
    %27 = vector.load %arg11[%c0_15, %c0_16, %c0_17] : memref<1x8x8xf32, #tpu.memory_space<vmem>>, vector<1x8x8xf32>
    tpu.vector_store %arg11[%c0_15, %c0_16, %c0_17], %26 {strides = array<i32>} : memref<1x8x8xf32, #tpu.memory_space<vmem>>, vector<1x8x8xf32>,
    %28 = arith.truncf %26 : vector<1x8x8xf32> to vector<1x8x8xbf16>
    %c0_18 = arith.constant 0 : index
    %c0_19 = arith.constant 0 : index
    %c0_20 = arith.constant 0 : index
    %29 = vector.load %arg13[%c0_18, %c0_19, %c0_20] : memref<1x8x32xbf16, #tpu.memory_space<vmem>>, vector<1x8x32xbf16>
    "tpu.trace_start"() <{level = 10 : i32, message = "bqk,bkd->bqd"}> : () -> ()
    %cst_21 = arith.constant dense<0.000000e+00> : vector<1x8x32xf32>
    %30 = tpu.matmul %28, %29, %cst_21 {dimension_numbers = #tpu.dot_dimension_numbers<[2], [1], [1], [2], [0, 0, 0, 1, 1, 2], [0], [0]>} : vector<1x8x8xbf16>, vector<1x8x32xbf16>, vector<1x8x32xf32> -> vector<1x8x32xf32>
    "tpu.trace_stop"() : () -> ()
    %31 = vector.shape_cast %30 : vector<1x8x32xf32> to vector<8x32xf32>
    %32 = arith.truncf %31 : vector<8x32xf32> to vector<8x32xbf16>
    %c0_22 = arith.constant 0 : index
    %c0_23 = arith.constant 0 : index
    %33 = vector.load %arg6[%c0_22, %c0_23] : memref<32x32xbf16, #tpu.memory_space<vmem>>, vector<32x32xbf16>
    %cst_24 = arith.constant dense<0.000000e+00> : vector<8x32xf32>
    %34 = tpu.matmul %32, %33, %cst_24 {dimension_numbers = #tpu.dot_dimension_numbers<[1], [0], [0], [1], [0, 0, 1, 1], [], []>} : vector<8x32xbf16>, vector<32x32xbf16>, vector<8x32xf32> -> vector<8x32xf32>
    %c0_25 = arith.constant 0 : index
    %c0_26 = arith.constant 0 : index
    %35 = vector.load %arg7[%c0_25, %c0_26] : memref<1x32xf32, #tpu.memory_space<vmem>>, vector<1x32xf32>
    %36 = vector.broadcast %35 : vector<1x32xf32> to vector<8x32xf32>
    %37 = arith.addf %34, %36 : vector<8x32xf32>
    %cst_27 = arith.constant 0.000000e+00 : f32
    %38 = vector.broadcast %cst_27 : f32 to vector<8x32xf32>
    %39 = arith.maximumf %37, %38 : vector<8x32xf32>
    %40 = arith.truncf %39 : vector<8x32xf32> to vector<8x32xbf16>
    %c0_28 = arith.constant 0 : index
    %c0_29 = arith.constant 0 : index
    %41 = vector.load %arg8[%c0_28, %c0_29] : memref<32x32xbf16, #tpu.memory_space<vmem>>, vector<32x32xbf16>
    %cst_30 = arith.constant dense<0.000000e+00> : vector<8x32xf32>
    %42 = tpu.matmul %40, %41, %cst_30 {dimension_numbers = #tpu.dot_dimension_numbers<[1], [0], [0], [1], [0, 0, 1, 1], [], []>} : vector<8x32xbf16>, vector<32x32xbf16>, vector<8x32xf32> -> vector<8x32xf32>
    %c0_31 = arith.constant 0 : index
    %c0_32 = arith.constant 0 : index
    %43 = vector.load %arg9[%c0_31, %c0_32] : memref<1x32xf32, #tpu.memory_space<vmem>>, vector<1x32xf32>
    %44 = vector.broadcast %43 : vector<1x32xf32> to vector<8x32xf32>
    %45 = arith.addf %42, %44 : vector<8x32xf32>
    %46 = vector.shape_cast %45 : vector<8x32xf32> to vector<1x8x32xf32>
    %47 = arith.addf %46, %3 : vector<1x8x32xf32>
    %c0_33 = arith.constant 0 : index
    %c0_34 = arith.constant 0 : index
    %c0_35 = arith.constant 0 : index
    %48 = vector.load %arg10[%c0_33, %c0_34, %c0_35] : memref<1x8x32xf32, #tpu.memory_space<vmem>>, vector<1x8x32xf32>
    tpu.vector_store %arg10[%c0_33, %c0_34, %c0_35], %47 {strides = array<i32>} : memref<1x8x32xf32, #tpu.memory_space<vmem>>, vector<1x8x32xf32>,
    return
  }
  func.func @transform_0(%arg0: i32, %arg1: i32) -> (i32, i32, i32) {
    %c0_i32 = arith.constant 0 : i32
    %c0_i32_0 = arith.constant 0 : i32
    %c0_i32_1 = arith.constant 0 : i32
    return %arg0, %c0_i32, %c0_i32_0 : i32, i32, i32
  }
  func.func @transform_1(%arg0: i32, %arg1: i32) -> (i32, i32, i32) {
    %c0_i32 = arith.constant 0 : i32
    %c0_i32_0 = arith.constant 0 : i32
    return %arg0, %arg1, %c0_i32 : i32, i32, i32
  }
  func.func @transform_2(%arg0: i32, %arg1: i32) -> (i32, i32) {
    %c0_i32 = arith.constant 0 : i32
    %c0_i32_0 = arith.constant 0 : i32
    %c0_i32_1 = arith.constant 0 : i32
    return %c0_i32, %c0_i32_0 : i32, i32
  }
  func.func @transform_3(%arg0: i32, %arg1: i32) -> (i32, i32) {
    %c0_i32 = arith.constant 0 : i32
    %c0_i32_0 = arith.constant 0 : i32
    %c0_i32_1 = arith.constant 0 : i32
    return %c0_i32, %c0_i32_0 : i32, i32
  }
  func.func @transform_4(%arg0: i32, %arg1: i32) -> (i32, i32) {
    %c0_i32 = arith.constant 0 : i32
    %c0_i32_0 = arith.constant 0 : i32
    %c0_i32_1 = arith.constant 0 : i32
    return %c0_i32, %c0_i32_0 : i32, i32
  }
  func.func @transform_5(%arg0: i32, %arg1: i32) -> (i32, i32) {
    %c0_i32 = arith.constant 0 : i32
    %c0_i32_0 = arith.constant 0 : i32
    %c0_i32_1 = arith.constant 0 : i32
    return %c0_i32, %c0_i32_0 : i32, i32
  }
  func.func @transform_6(%arg0: i32, %arg1: i32) -> (i32, i32) {
    %c0_i32 = arith.constant 0 : i32
    %c0_i32_0 = arith.constant 0 : i32
    %c0_i32_1 = arith.constant 0 : i32
    return %c0_i32, %c0_i32_0 : i32, i32
  }
  func.func @transform_7(%arg0: i32, %arg1: i32) -> (i32, i32) {
    %c0_i32 = arith.constant 0 : i32
    %c0_i32_0 = arith.constant 0 : i32
    %c0_i32_1 = arith.constant 0 : i32
    return %c0_i32, %c0_i32_0 : i32, i32
  }
  func.func @transform_8(%arg0: i32, %arg1: i32) -> (i32, i32, i32) {
    %c0_i32 = arith.constant 0 : i32
    %c0_i32_0 = arith.constant 0 : i32
    return %arg0, %arg1, %c0_i32 : i32, i32, i32
  }
  func.func @transform_9(%arg0: i32, %arg1: i32) -> (i32, i32, i32) {
    %c0_i32 = arith.constant 0 : i32
    %c0_i32_0 = arith.constant 0 : i32
    return %arg0, %arg1, %c0_i32 : i32, i32, i32
  }
}

module attributes {stable_mosaic.version = 11 : i64} {
  func.func @_attnet_kernel(%arg0: i32, %arg1: i32, %arg2: memref<1x8x32xf32, #tpu.memory_space<vmem>>, %arg3: memref<1x8x1xf32, #tpu.memory_space<vmem>>, %arg4: memref<32x64xbf16, #tpu.memory_space<vmem>>, %arg5: memref<32x96xbf16, #tpu.memory_space<vmem>>, %arg6: memref<32x32xbf16, #tpu.memory_space<vmem>>, %arg7: memref<1x32xf32, #tpu.memory_space<vmem>>, %arg8: memref<32x32xbf16, #tpu.memory_space<vmem>>, %arg9: memref<1x32xf32, #tpu.memory_space<vmem>>, %arg10: memref<1x8x32xf32, #tpu.memory_space<vmem>>, %arg11: memref<1x8x8xf32, #tpu.memory_space<vmem>>, %arg12: memref<1x8x64xbf16, #tpu.memory_space<vmem>>, %arg13: memref<1x8x32xbf16, #tpu.memory_space<vmem>>) attributes {dimension_semantics = [#tpu.dimension_semantics<parallel>, #tpu.dimension_semantics<arbitrary>], iteration_bounds = array<i64: 2, 1>, scalar_prefetch = 0 : i64, scratch_operands = 2 : i64, tpu.core_type = #tpu.core_type<tc>, window_params = [{transform_indices = @transform_0, window_bounds = array<i64: 1, 8, 32>}, {transform_indices = @transform_1, window_bounds = array<i64: 1, 8, 1>}, {pipeline_mode = #tpu.pipeline_mode<synchronous>, transform_indices = @transform_2, window_bounds = array<i64: 32, 64>}, {pipeline_mode = #tpu.pipeline_mode<synchronous>, transform_indices = @transform_3, window_bounds = array<i64: 32, 96>}, {pipeline_mode = #tpu.pipeline_mode<synchronous>, transform_indices = @transform_4, window_bounds = array<i64: 32, 32>}, {pipeline_mode = #tpu.pipeline_mode<synchronous>, transform_indices = @transform_5, window_bounds = array<i64: 1, 32>}, {pipeline_mode = #tpu.pipeline_mode<synchronous>, transform_indices = @transform_6, window_bounds = array<i64: 32, 32>}, {pipeline_mode = #tpu.pipeline_mode<synchronous>, transform_indices = @transform_7, window_bounds = array<i64: 1, 32>}, {transform_indices = @transform_8, window_bounds = array<i64: 1, 8, 32>}, {transform_indices = @transform_9, window_bounds = array<i64: 1, 8, 8>}]} {
    %c0_i32 = arith.constant 0 : i32
    %0 = arith.cmpi eq, %arg1, %c0_i32 : i32
    %1 = arith.extui %0 : i1 to i32
    %c0_i32_0 = arith.constant 0 : i32
    %2 = arith.cmpi ne, %1, %c0_i32_0 : i32
    scf.if %2 {
      %c0_36 = arith.constant 0 : index
      %c0_37 = arith.constant 0 : index
      %c0_38 = arith.constant 0 : index
      %49 = vector.load %arg2[%c0_36, %c0_37, %c0_38] : memref<1x8x32xf32, #tpu.memory_space<vmem>>, vector<1x8x32xf32>
      %50 = vector.shape_cast %49 : vector<1x8x32xf32> to vector<8x32xf32>
      %51 = arith.truncf %50 : vector<8x32xf32> to vector<8x32xbf16>
      %c0_39 = arith.constant 0 : index
      %c0_40 = arith.constant 0 : index
      %52 = vector.load %arg5[%c0_39, %c0_40] : memref<32x96xbf16, #tpu.memory_space<vmem>>, vector<32x96xbf16>
      %cst_41 = arith.constant dense<0.000000e+00> : vector<8x96xf32>
      %53 = tpu.matmul %51, %52, %cst_41 {dimension_numbers = #tpu.dot_dimension_numbers<[1], [0], [0], [1], [0, 0, 1, 1], [], []>} : vector<8x32xbf16>, vector<32x96xbf16>, vector<8x96xf32> -> vector<8x96xf32>
      %54 = vector.extract_strided_slice %53 {offsets = [0, 0], sizes = [8, 64], strides = [1, 1]} : vector<8x96xf32> to vector<8x64xf32>
      %55 = vector.extract_strided_slice %53 {offsets = [0, 64], sizes = [8, 32], strides = [1, 1]} : vector<8x96xf32> to vector<8x32xf32>
      %56 = vector.shape_cast %54 : vector<8x64xf32> to vector<1x8x64xf32>
      %57 = arith.truncf %56 : vector<1x8x64xf32> to vector<1x8x64xbf16>
      %c0_42 = arith.constant 0 : index
      %c0_43 = arith.constant 0 : index
      %c0_44 = arith.constant 0 : index
      %58 = vector.load %arg12[%c0_42, %c0_43, %c0_44] : memref<1x8x64xbf16, #tpu.memory_space<vmem>>, vector<1x8x64xbf16>
      tpu.vector_store %arg12[%c0_42, %c0_43, %c0_44], %57 {strides = array<i32>} : memref<1x8x64xbf16, #tpu.memory_space<vmem>>, vector<1x8x64xbf16>,
      %59 = vector.shape_cast %55 : vector<8x32xf32> to vector<1x8x32xf32>
      %60 = arith.truncf %59 : vector<1x8x32xf32> to vector<1x8x32xbf16>
      %c0_45 = arith.constant 0 : index
      %c0_46 = arith.constant 0 : index
      %c0_47 = arith.constant 0 : index
      %61 = vector.load %arg13[%c0_45, %c0_46, %c0_47] : memref<1x8x32xbf16, #tpu.memory_space<vmem>>, vector<1x8x32xbf16>
      tpu.vector_store %arg13[%c0_45, %c0_46, %c0_47], %60 {strides = array<i32>} : memref<1x8x32xbf16, #tpu.memory_space<vmem>>, vector<1x8x32xbf16>,
    } else {
    }
    %c0 = arith.constant 0 : index
    %c0_1 = arith.constant 0 : index
    %c0_2 = arith.constant 0 : index
    %3 = vector.load %arg2[%c0, %c0_1, %c0_2] : memref<1x8x32xf32, #tpu.memory_space<vmem>>, vector<1x8x32xf32>
    %4 = vector.shape_cast %3 : vector<1x8x32xf32> to vector<8x32xf32>
    %5 = arith.truncf %4 : vector<8x32xf32> to vector<8x32xbf16>
    %c0_3 = arith.constant 0 : index
    %c0_4 = arith.constant 0 : index
    %6 = vector.load %arg4[%c0_3, %c0_4] : memref<32x64xbf16, #tpu.memory_space<vmem>>, vector<32x64xbf16>
    %cst = arith.constant dense<0.000000e+00> : vector<8x64xf32>
    %7 = tpu.matmul %5, %6, %cst {dimension_numbers = #tpu.dot_dimension_numbers<[1], [0], [0], [1], [0, 0, 1, 1], [], []>} : vector<8x32xbf16>, vector<32x64xbf16>, vector<8x64xf32> -> vector<8x64xf32>
    %cst_5 = arith.constant 0.176776692 : f32
    %8 = vector.broadcast %cst_5 : f32 to vector<8x64xf32>
    %9 = arith.mulf %7, %8 : vector<8x64xf32>
    %10 = vector.shape_cast %9 : vector<8x64xf32> to vector<1x8x64xf32>
    %c0_6 = arith.constant 0 : index
    %c0_7 = arith.constant 0 : index
    %c0_8 = arith.constant 0 : index
    %11 = vector.load %arg3[%c0_6, %c0_7, %c0_8] : memref<1x8x1xf32, #tpu.memory_space<vmem>>, vector<1x8x1xf32>
    %12 = vector.broadcast %11 : vector<1x8x1xf32> to vector<1x8x64xf32>
    %13 = arith.mulf %10, %12 : vector<1x8x64xf32>
    %14 = arith.truncf %13 : vector<1x8x64xf32> to vector<1x8x64xbf16>
    %c0_9 = arith.constant 0 : index
    %c0_10 = arith.constant 0 : index
    %c0_11 = arith.constant 0 : index
    %15 = vector.load %arg12[%c0_9, %c0_10, %c0_11] : memref<1x8x64xbf16, #tpu.memory_space<vmem>>, vector<1x8x64xbf16>
    "tpu.trace_start"() <{level = 10 : i32, message = "bqe,bke->bqk"}> : () -> ()
    %cst_12 = arith.constant dense<0.000000e+00> : vector<1x8x8xf32>
    %16 = tpu.matmul %14, %15, %cst_12 {dimension_numbers = #tpu.dot_dimension_numbers<[2], [2], [1], [1], [0, 0, 0, 1, 1, 1], [0], [0]>} : vector<1x8x64xbf16>, vector<1x8x64xbf16>, vector<1x8x8xf32> -> vector<1x8x8xf32>
    "tpu.trace_stop"() : () -> ()
    %cst_13 = arith.constant dense<0xFF800000> : vector<1x8xf32>
    %17 = vector.multi_reduction <maximumf>, %16, %cst_13 [2] : vector<1x8x8xf32> to vector<1x8xf32>
    %18 = vector.shape_cast %17 : vector<1x8xf32> to vector<1x8x1xf32>
    %19 = vector.broadcast %18 : vector<1x8x1xf32> to vector<1x8x8xf32>
    %20 = arith.subf %16, %19 : vector<1x8x8xf32>
    %21 = math.exp %20 : vector<1x8x8xf32>
    %cst_14 = arith.constant dense<0.000000e+00> : vector<1x8xf32>
    %22 = vector.multi_reduction <add>, %21, %cst_14 [2] : vector<1x8x8xf32> to vector<1x8xf32>
    %23 = vector.shape_cast %22 : vector<1x8xf32> to vector<1x8x1xf32>
    %24 = tpu.reciprocal %23 {approx = true} : vector<1x8x1xf32> -> vector<1x8x1xf32>
    %25 = vector.broadcast %24 : vector<1x8x1xf32> to vector<1x8x8xf32>
    %26 = arith.mulf %21, %25 : vector<1x8x8xf32>
    %c0_15 = arith.constant 0 : index
    %c0_16 = arith.constant 0 : index
    %c0_17 = arith.constant 0 : index
    %27 = vector.load %arg11[%c0_15, %c0_16, %c0_17] : memref<1x8x8xf32, #tpu.memory_space<vmem>>, vector<1x8x8xf32>
    tpu.vector_store %arg11[%c0_15, %c0_16, %c0_17], %26 {strides = array<i32>} : memref<1x8x8xf32, #tpu.memory_space<vmem>>, vector<1x8x8xf32>,
    %28 = arith.truncf %26 : vector<1x8x8xf32> to vector<1x8x8xbf16>
    %c0_18 = arith.constant 0 : index
    %c0_19 = arith.constant 0 : index
    %c0_20 = arith.constant 0 : index
    %29 = vector.load %arg13[%c0_18, %c0_19, %c0_20] : memref<1x8x32xbf16, #tpu.memory_space<vmem>>, vector<1x8x32xbf16>
    "tpu.trace_start"() <{level = 10 : i32, message = "bqk,bkd->bqd"}> : () -> ()
    %cst_21 = arith.constant dense<0.000000e+00> : vector<1x8x32xf32>
    %30 = tpu.matmul %28, %29, %cst_21 {dimension_numbers = #tpu.dot_dimension_numbers<[2], [1], [1], [2], [0, 0, 0, 1, 1, 2], [0], [0]>} : vector<1x8x8xbf16>, vector<1x8x32xbf16>, vector<1x8x32xf32> -> vector<1x8x32xf32>
    "tpu.trace_stop"() : () -> ()
    %31 = vector.shape_cast %30 : vector<1x8x32xf32> to vector<8x32xf32>
    %32 = arith.truncf %31 : vector<8x32xf32> to vector<8x32xbf16>
    %c0_22 = arith.constant 0 : index
    %c0_23 = arith.constant 0 : index
    %33 = vector.load %arg6[%c0_22, %c0_23] : memref<32x32xbf16, #tpu.memory_space<vmem>>, vector<32x32xbf16>
    %cst_24 = arith.constant dense<0.000000e+00> : vector<8x32xf32>
    %34 = tpu.matmul %32, %33, %cst_24 {dimension_numbers = #tpu.dot_dimension_numbers<[1], [0], [0], [1], [0, 0, 1, 1], [], []>} : vector<8x32xbf16>, vector<32x32xbf16>, vector<8x32xf32> -> vector<8x32xf32>
    %c0_25 = arith.constant 0 : index
    %c0_26 = arith.constant 0 : index
    %35 = vector.load %arg7[%c0_25, %c0_26] : memref<1x32xf32, #tpu.memory_space<vmem>>, vector<1x32xf32>
    %36 = vector.broadcast %35 : vector<1x32xf32> to vector<8x32xf32>
    %37 = arith.addf %34, %36 : vector<8x32xf32>
    %cst_27 = arith.constant 0.000000e+00 : f32
    %38 = vector.broadcast %cst_27 : f32 to vector<8x32xf32>
    %39 = arith.maximumf %37, %38 : vector<8x32xf32>
    %40 = arith.truncf %39 : vector<8x32xf32> to vector<8x32xbf16>
    %c0_28 = arith.constant 0 : index
    %c0_29 = arith.constant 0 : index
    %41 = vector.load %arg8[%c0_28, %c0_29] : memref<32x32xbf16, #tpu.memory_space<vmem>>, vector<32x32xbf16>
    %cst_30 = arith.constant dense<0.000000e+00> : vector<8x32xf32>
    %42 = tpu.matmul %40, %41, %cst_30 {dimension_numbers = #tpu.dot_dimension_numbers<[1], [0], [0], [1], [0, 0, 1, 1], [], []>} : vector<8x32xbf16>, vector<32x32xbf16>, vector<8x32xf32> -> vector<8x32xf32>
    %c0_31 = arith.constant 0 : index
    %c0_32 = arith.constant 0 : index
    %43 = vector.load %arg9[%c0_31, %c0_32] : memref<1x32xf32, #tpu.memory_space<vmem>>, vector<1x32xf32>
    %44 = vector.broadcast %43 : vector<1x32xf32> to vector<8x32xf32>
    %45 = arith.addf %42, %44 : vector<8x32xf32>
    %46 = vector.shape_cast %45 : vector<8x32xf32> to vector<1x8x32xf32>
    %47 = arith.addf %46, %3 : vector<1x8x32xf32>
    %c0_33 = arith.constant 0 : index
    %c0_34 = arith.constant 0 : index
    %c0_35 = arith.constant 0 : index
    %48 = vector.load %arg10[%c0_33, %c0_34, %c0_35] : memref<1x8x32xf32, #tpu.memory_space<vmem>>, vector<1x8x32xf32>
    tpu.vector_store %arg10[%c0_33, %c0_34, %c0_35], %47 {strides = array<i32>} : memref<1x8x32xf32, #tpu.memory_space<vmem>>, vector<1x8x32xf32>,
    return
  }
  func.func @transform_0(%arg0: i32, %arg1: i32) -> (i32, i32, i32) {
    %c0_i32 = arith.constant 0 : i32
    %c0_i32_0 = arith.constant 0 : i32
    %c0_i32_1 = arith.constant 0 : i32
    return %arg0, %c0_i32, %c0_i32_0 : i32, i32, i32
  }
  func.func @transform_1(%arg0: i32, %arg1: i32) -> (i32, i32, i32) {
    %c0_i32 = arith.constant 0 : i32
    %c0_i32_0 = arith.constant 0 : i32
    return %arg0, %arg1, %c0_i32 : i32, i32, i32
  }
  func.func @transform_2(%arg0: i32, %arg1: i32) -> (i32, i32) {
    %c0_i32 = arith.constant 0 : i32
    %c0_i32_0 = arith.constant 0 : i32
    %c0_i32_1 = arith.constant 0 : i32
    return %c0_i32, %c0_i32_0 : i32, i32
  }
  func.func @transform_3(%arg0: i32, %arg1: i32) -> (i32, i32) {
    %c0_i32 = arith.constant 0 : i32
    %c0_i32_0 = arith.constant 0 : i32
    %c0_i32_1 = arith.constant 0 : i32
    return %c0_i32, %c0_i32_0 : i32, i32
  }
  func.func @transform_4(%arg0: i32, %arg1: i32) -> (i32, i32) {
    %c0_i32 = arith.constant 0 : i32
    %c0_i32_0 = arith.constant 0 : i32
    %c0_i32_1 = arith.constant 0 : i32
    return %c0_i32, %c0_i32_0 : i32, i32
  }
  func.func @transform_5(%arg0: i32, %arg1: i32) -> (i32, i32) {
    %c0_i32 = arith.constant 0 : i32
    %c0_i32_0 = arith.constant 0 : i32
    %c0_i32_1 = arith.constant 0 : i32
    return %c0_i32, %c0_i32_0 : i32, i32
  }
  func.func @transform_6(%arg0: i32, %arg1: i32) -> (i32, i32) {
    %c0_i32 = arith.constant 0 : i32
    %c0_i32_0 = arith.constant 0 : i32
    %c0_i32_1 = arith.constant 0 : i32
    return %c0_i32, %c0_i32_0 : i32, i32
  }
  func.func @transform_7(%arg0: i32, %arg1: i32) -> (i32, i32) {
    %c0_i32 = arith.constant 0 : i32
    %c0_i32_0 = arith.constant 0 : i32
    %c0_i32_1 = arith.constant 0 : i32
    return %c0_i32, %c0_i32_0 : i32, i32
  }
  func.func @transform_8(%arg0: i32, %arg1: i32) -> (i32, i32, i32) {
    %c0_i32 = arith.constant 0 : i32
    %c0_i32_0 = arith.constant 0 : i32
    return %arg0, %arg1, %c0_i32 : i32, i32, i32
  }
  func.func @transform_9(%arg0: i32, %arg1: i32) -> (i32, i32, i32) {
    %c0_i32 = arith.constant 0 : i32
    %c0_i32_0 = arith.constant 0 : i32
    return %arg0, %arg1, %c0_i32 : i32, i32, i32
  }
}

</mosaic_0001>

<bundles_post_ra>
// kernel: tpu_custom_call.1
= control target key start
LH: loop header
LB: loop body
LE: loop exit
PB: predicated region body
PF: predicated region fallthrough
CT: control target
= control target key end

     0   :  { %s1546_s0 = inlined_call_operand.vmem [shape: f32[2,8,32], index: 0, kind: input, shape index: {}]   ;;  %s1547_s1 = inlined_call_operand.vmem [shape: f32[2,8,1], index: 1, kind: input, shape index: {}]   ;;  %s1548_s2 = inlined_call_operand.hbm [shape: bf16[32,64], index: 2, kind: input, shape index: {}]   ;;  %s1549_s3 = inlined_call_operand.hbm [shape: bf16[32,96], index: 3, kind: input, shape index: {}]   ;;  %s1550_s4 = inlined_call_operand.hbm [shape: bf16[32,32], index: 4, kind: input, shape index: {}]   ;;  %s1551_s5 = inlined_call_operand.vmem [shape: f32[1,32], index: 5, kind: input, shape index: {}]   ;;  %s1552_s6 = inlined_call_operand.hbm [shape: bf16[32,32], index: 6, kind: input, shape index: {}]   ;;  %s1553_s7 = inlined_call_operand.vmem [shape: f32[1,32], index: 7, kind: input, shape index: {}]   ;;  %s1554_s8 = inlined_call_operand.hbm [shape: f32[2,8,32], index: 8, kind: output, shape index: {0}]   ;;  %s1555_s9 = inlined_call_operand.hbm [shape: f32[2,8,8], index: 9, kind: output, shape index: {1}]  }
   0x1   :  { %1561 = sst [smem:[#allocation26_spill]] %s1549_s3 }
   0x2   :  { %15 = vsyncpa [#allocation5], 0 }
   0x3   :  { %16 = vsyncpa [#allocation8], 0 }
   0x4   :  { %17 = vsyncpa [#allocation11], 0 }
   0x5   :  { %18 = vsyncpa [#allocation6], 0 }
   0x6   :  { %20 = vsyncpa [#allocation6 + $0x1], 0 }
   0x7   :  { %21 = vsyncpa [#allocation14], 0 }
   0x8   :  { %23 = vsyncpa [#allocation14 + $0x1], 0  ;;  %s1354_s30 = smov 0   ;;  %s1356_s10 = smov 0  }
   0x9   :  { %s1358_s11 = smov 0   ;;  %s1360_s12 = smov 0  }
   0xa   :  { %s1362_s13 = smov 0   ;;  %s1364_s14 = smov 0  }
   0xb LB: > { %1562 = sst [smem:[#allocation20_spill]] %s1274_s30  ;;  %s871_s15 = sadd.s32 4294967295, %s1294_s14   ;;  %s1294_s14 = sphi %s1364_s14, %s29_s14   ;;  %s1290_s13 = sphi %s1362_s13, %s1579_s13   ;;  %s1286_s12 = sphi %s1360_s12, %s1578_s12   ;;  %s1282_s11 = sphi %s1358_s11, %s1577_s11   ;;  %s1278_s10 = sphi %s1356_s10, %s1581_s10   ;;  %s1274_s30 = sphi %s1354_s30, %s1580_s30  }
   0xc   : > { %1563 = sst [smem:[#allocation21_spill]] %s1282_s11  ;;  %s872_s16 = sadd.s32 4294967294, %s1294_s14  }
   0xd   : > { %1564 = sst [smem:[#allocation22_spill]] %s1290_s13  ;;  %s41_s17 = sadd.s32 1, %s1290_s13 }
   0xe   : > { %s230_s18 = sadd.s32 1, %s1282_s11  ;;  %p43_p0 = scmp.ge.s32.totalorder %s41_s17, 2 }
   0xf   : > { %p240_p1 = scmp.ne.s32.totalorder %s1282_s11, %s1278_s10  ;;  %p241_p2 = scmp.eq.s32.totalorder %s871_s15, 1 }
  0x10   : > { %p246_p3 = scmp.ne.s32.totalorder %s1278_s10, %s1274_s30  ;;  %s1583_s17 = smov (%p43_p0, %s41_s17), 0 }
  0x11   : > { %1565 = sst [smem:[#allocation23_spill]] %s1583_s17  ;;  %p1394_p4 = por %p241_p2, %p240_p1 }
  0x12   : > { %p247_p5 = scmp.eq.s32.totalorder %s872_s16, 1  ;;  %s225_s20 = ssub.s32 %s1290_s13, %s1583_s17 }
  0x13   : > { %p873_p6 = scmp.ge.s32.totalorder %s1294_s14, 1  ;;  %p228_p7 = scmp.eq.s32.totalorder %s225_s20, 0 }
  0x14   : > { %p1401_p8 = por %p247_p5, %p246_p3  ;;  %p282_p9 = scmp.lt.s32.totalorder %s1294_s14, 3 }
  0x15   : > { %s1407_s22 = scalar_select %p228_p7, %s1282_s11, %s230_s18  }
  0x16   : > { %s1567_s21 = scalar_select %p1401_p8, 1, 0 }
  0x17   : > { %1569 = sst [smem:[#allocation25_spill]] %s1407_s22  ;;  %p1409_p10 = pnand %p873_p6, %p282_p9 }
  0x18   : > { %1568 = sst [smem:[#allocation24_spill]] %s1567_s21  ;;  %p1413_p11 = scmp.eq.s32.totalorder %s871_s15, 0 }
  0x19   : > { %p960_p12 = pneg %p1409_p10  ;;  %s1572_s3 = sld [smem:[#allocation26_spill]] }
  0x1a   : > { %s1296_s29 = smov [#allocation7]   ;;  %s1297_s16 = smov 64  }
  0x1b   : > { %p1424_p13 = pnand %p1413_p11, %p960_p12  ;;  %s309_s15 = sshll.u32 %s1296_s29, 4  ;;  %s310_s15 = int_to_ptr.vmem [resolvable:$true] %s309_s15 }
  0x1c   : > { %s1298_s18 = smov 4   ;;  %s293_s25 = sshll.u32 %s1548_s2, 4  ;;  %s294_s25 = int_to_ptr.hbm [resolvable:$true] %s293_s25 }
  0x1d   : > { %s1299_s26 = smov [#allocation4]   ;;  %s321_s11 = sshll.u32 %s1550_s4, 4  ;;  %s322_s11 = int_to_ptr.hbm [resolvable:$true] %s321_s11 }
  0x1e   : > { %s1300_s29 = smov [#allocation9]   ;;  %s1301_s17 = smov [#allocation10]  }
  0x1f   : > { %s307_s27 = sshll.u32 %s1572_s3, 4  ;;  %s295_s3 = sshll.u32 %s1299_s26, 4  ;;  %s308_s27 = int_to_ptr.hbm [resolvable:$true] %s307_s27  ;;  %s296_s3 = int_to_ptr.vmem [resolvable:$true] %s295_s3 }
  0x20   : > { %966 = dma.hbm_to_vmem [thread:$0]  (!%p1424_p13), %s308_s27, 256, %s310_s15, [#allocation8], %s1297_s16, %s1297_s16, %s1298_s18  }
  0x21   : > { %963 = dma.hbm_to_vmem [thread:$0]  (!%p1424_p13), %s294_s25, 256, %s296_s3, [#allocation5], %s1297_s16, %s1297_s16, %s1298_s18  }
  0x22   : > { %s323_s21 = sshll.u32 %s1300_s29, 4  ;;  %s338_s15 = sshll.u32 %s1552_s6, 4  ;;  %s324_s21 = int_to_ptr.vmem [resolvable:$true] %s323_s21  ;;  %s339_s15 = int_to_ptr.hbm [resolvable:$true] %s338_s15 }
  0x23   : > { %969 = dma.hbm_to_vmem [thread:$0]  (!%p1424_p13), %s322_s11, 256, %s324_s21, [#allocation8], %s1297_s16, %s1297_s16, %s1298_s18  }
  0x24   : > { %s340_s20 = sshll.u32 %s1301_s17, 4  ;;  %376 = sbr.rel (%p1409_p10) target bundleno = 993 (0x3e1), region = 52  ;;  %s341_s20 = int_to_ptr.vmem [resolvable:$true] %s340_s20 }
  0x25   : > { %972 = dma.hbm_to_vmem [thread:$0]  (!%p1424_p13), %s339_s15, 256, %s341_s20, [#allocation11], %s1297_s16, %s1297_s16, %s1298_s18  }
  0x29   : > { %1253 = dma.done.wait (%p1413_p11), [#allocation5], 256  }
  0x2a   : > { %1255 = vsyncadd (%p1413_p11), [#allocation5], 4294967040 }
  0x2b   : > { %1257 = dma.done.wait (%p1413_p11), [#allocation8], 512  }
  0x2c   : > { %1259 = vsyncadd (%p1413_p11), [#allocation8], 4294966784 }
  0x2d   : > { %1261 = dma.done.wait (%p1413_p11), [#allocation11], 256  }
  0x2e   : > { %1263 = vsyncadd (%p1413_p11), [#allocation11], 4294967040  ;;  %p439_p0 = scmp.lt.s32.totalorder %s1286_s12, 1  ;;  %v1302_v0 = vmov 0   ;;  %v933_v1 = vld [vmem:[#allocation7 + $0x8] sm:$0xff]  ;;  %v935_v2 = vld [vmem:[#allocation4 + $0x8] sm:$0xff] }
  0x2f   : > { %1045 = vset.pattern.permute.xlu0 %v1302_v0  ;;  %v932_v3 = vld [vmem:[#allocation7] sm:$0xff]  ;;  %483 = vmatpush.bf16.msra.mxu0 %v933_v1  ;;  %v934_v6 = vld [vmem:[#allocation4] sm:$0xff]  ;;  %vm473_vm0 = vcmask 261120   ;;  %vm491_vm1 = vcmask 519168   ;;  %s1303_s24 = smov 64   ;;  %vm544_vm2 = vcmask 523264  }
  0x30   : > { %s440_s3 = scalar_select %p439_p0, %s1286_s12, 1  ;;  %527 = vmatpush.bf16.msra.mxu1 %v935_v2  ;;  %vm497_vm3 = vcmask 257024   ;;  %vm582_vm4 = vcmask 1043456   ;;  %vm564_vm5 = vcmask 64512   ;;  %v937_v30 = vld [vmem:[#allocation9 + $0x8] sm:$0xff]  ;;  %v936_v31 = vld [vmem:[#allocation9] sm:$0xff] }
  0x31   : > { %s1476_s16 = sand.u32 1, %s1278_s10   ;;  %v939_v36 = vld [vmem:[#allocation10 + $0x8] sm:$0xff]  ;;  %v938_v37 = vld [vmem:[#allocation10] sm:$0xff]  ;;  %s928_s27 = sshll.u32 %s1286_s12, 3 }
  0x32   : > { %s886_s30 = sshll.u32 %s440_s3, 3  ;;  %s884_s18 = sshll.u32 %s1476_s16, 3  ;;  %v1046_v41 = vld [vmem:[%s1551_s5] ss:$0 sm:$0xff] }
  0x33   : > { %s442_s21 = scalar_lea.vmem %s1546_s0, %s886_s30  ;;  %s449_s28 = scalar_lea.vmem %s1547_s1, %s886_s30  ;;  %484 = vmatpush.bf16.msra.mxu0 %v932_v3 }
  0x34   : > { %v1467_v4 = vld [vmem:[%s442_s21] sm:$0xff]  ;;  %528 = vmatpush.bf16.msra.mxu1 %v934_v6  ;;  %s438_s25 = scalar_lea.vmem [#allocation13], %s884_s18  ;;  %s708_s20 = scalar_lea.hbm %s1555_s9, %s928_s27 }
  0x35   : > { %v535_v5 = vld [vmem:[%s449_s28] sm:$0xff]  ;;  %v456_v7 = vpack.c.bf16 %v1467_v4, %v1467_v4  ;;  %s710_s3 = sshll.u32 %s438_s25, 4  ;;  %s712_s30 = sshll.u32 %s708_s20, 4  ;;  %s711_s3 = int_to_ptr.vmem [resolvable:$true] %s710_s3  ;;  %s713_s30 = int_to_ptr.hbm [resolvable:$true] %s712_s30 }
  0x36   : > { %538 = vperm.xlu0 %1045, %v535_v5   ;;  %s682_s11 = scalar_lea.sflag [#allocation14], %s1476_s16  ;;  %s1186_s13 = sshra.s32 %s713_s30, 4  ;;  %s1187_s13 = int_to_ptr.hbm [resolvable:$true] %s1186_s13 }
  0x37   : > { %896 = vmatmul.msk.bf16.vlgmr.msra.gmra.mxu0 %vm473_vm0, %v456_v7  ;;  %905 = vmatmul.msk.bf16.vlgmr.msra.gmra.mxu1 %vm473_vm0, %v456_v7  ;;  %s1188_s21 = scalar_lea.hbm %s1187_s13, 8  ;;  %s1192_s12 = scalar_lea.hbm %s1555_s9, 16 }
  0x38   : > { %667 = vmatpush.bf16.msrb.mxu0 %v939_v36  ;;  %p1189_p1 = scmp.ne.s32.totalorder %s1187_s13, %s1188_s21  ;;  %p1193_p5 = scmp.lt.s32.totalorder %s1187_s13, %s1555_s9 }
  0x39   : > { %p1194_p6 = scmp.lt.s32.totalorder %s1192_s12, %s1188_s21 }
  0x3a   : > { %p1190_p2 = pnand %p1189_p1, %p1394_p4 }
  0x3b   : > { %p1195_p7 = por %p1194_p6, %p1193_p5 }
  0x3c   : > { %668 = vmatpush.bf16.msrb.mxu0 %v938_v37  ;;  %p1191_p3 = pneg %p1190_p2 }
  0x3e   : > { %p1196_p9 = pnand %p1195_p7, %p1191_p3 }
  0xa8   : > { %v539_v12 = vpop.permute.xlu0 %538 }
  0xb4   : > { %v486_v8 = vpop.f32.mrf.mxu0  ;;  %v530_v9 = vpop.f32.mrf.mxu1 }
  0xb5   : > { %v490_v10 = vpack.c.bf16 %v486_v8, %v486_v8  ;;  %v534_v11 = vmul.f32 0.17677669, %v530_v9 }
  0xb7   : > { %492 = vst.msk [vmem:[#allocation2] sm:$0xf] %vm491_vm1, %v490_v10  ;;  %494 = vrot.lane.b32.xlu1 %v490_v10, %s1303_s24  ;;  %v541_v17 = vmul.f32 %v539_v12, %v534_v11 }
  0xb9   : > { %v542_v18 = vpack.c.bf16 %v541_v17, %v541_v17 }
  0xbc   : > { %v488_v13 = vpop.f32.mrf.mxu0  ;;  %v532_v14 = vpop.f32.mrf.mxu1 }
  0xbe   : > { %v543_v15 = vld [vmem:[#allocation2] sm:$0xf] }
  0xbf   : > { %v549_v16 = vsel %vm544_vm2, %v543_v15, 0 }
  0xc0   : > { %558 = vmatpush.bf16.xpose.msra.mxu2 %v549_v16 }
  0xc7   : > { %906 = vmatmul.msk.bf16.vlgmr.msra.gmra.mxu2 %vm544_vm2, %v542_v18 }
 0x129   : > { %v495_v19 = vpop.permute.xlu1 %494 }
 0x12a   : > { %498 = vst.msk [vmem:[#allocation3] sm:$0xf] %vm497_vm3, %v495_v19 }
 0x131   : > { %v578_v20 = vld [vmem:[#allocation3] sm:$0xf] }
 0x132   : > { %v584_v21 = vsel %vm582_vm4, %v578_v20, 0 }
 0x133   : > { %593 = vmatpush.bf16.msra.mxu3 %v584_v21 }
 0x137   : > { %629 = vmatpush.bf16.msrb.mxu3 %v937_v30 }
 0x13b   : > { %630 = vmatpush.bf16.msrb.mxu3 %v936_v31 }
 0x14a   : > { %v560_v22 = vpop.f32.mrf.mxu2 }
 0x14b   : > { %v565_v23 = vsel %vm564_vm5, %v560_v22, -inf }
 0x14c   : > { %566 = vmax.xlane.f32.xlu0 %v565_v23 }
 0x152   : > { %v562_v24 = vpop.f32.mrf.mxu2 }
 0x1bf   : > { %v567_v25 = vpop.xlane.xlu0 %566 }
 0x1c0   : > { %v568_v26 = vsub.f32 %v560_v22, %v567_v25 }
 0x1c2   : > { %v569_v27 = vmul.f32 1.442695, %v568_v26 }
 0x1c4   : > { %1048 = vpow2.f32 %v569_v27 }
 0x1ca   : > { %v1049_v28 = vpop.eup %1048 }
 0x1cb   : > { %v571_v29 = vsel %vm564_vm5, %v1049_v28, 0.0 }
 0x1cc   : > { %572 = vadd.xlane.f32.xlu1 %v571_v29 }
 0x23f   : > { %v573_v32 = vpop.xlane.xlu1 %572 }
 0x240   : > { %1050 = vrcp.f32 %v573_v32 }
 0x246   : > { %v1051_v33 = vpop.eup %1050 }
 0x247   : > { %v575_v34 = vmul.f32 %v1051_v33, %v1049_v28 }
 0x249   : > { %v577_v35 = vpack.c.bf16 %v575_v34, %v575_v34  ;;  %576 = vst.msk [vmem:[%s438_s25] sm:$0xff] %vm564_vm5, %v575_v34 }
 0x24b   : > { %907 = vmatmul.msk.bf16.vlgmr.msra.gmra.mxu3 %vm564_vm5, %v577_v35 }
 0x2ce   : > { %v595_v38 = vpop.f32.mrf.mxu3 }
 0x2cf   : > { %v599_v39 = vpack.c.bf16 %v595_v38, %v595_v38 }
 0x2d1   : > { %916 = vmatmul.msk.bf16.vlgmr.msrb.gmra.mxu3 %vm473_vm0, %v599_v39 }
 0x2d6   : > { %v597_v40 = vpop.f32.mrf.mxu3 }
 0x354   : > { %v632_v42 = vpop.f32.mrf.mxu3 }
 0x355   : > { %v633_v43 = vadd.f32 %v1046_v41, %v632_v42 }
 0x357   : > { %v636_v44 = vmax.f32 %v633_v43, 0.0 }
 0x359   : > { %v637_v45 = vpack.c.bf16 %v636_v44, %v636_v44 }
 0x35b   : > { %925 = vmatmul.msk.bf16.vlgmr.msrb.gmra.mxu0 %vm473_vm0, %v637_v45 }
 0x35c   : > { %v634_v46 = vpop.f32.mrf.mxu3 }
 0x35d   : > { %1199 = shalt.err (!%p1196_p9)
}
 0x35e   : > { %957 = dma.vmem_to_hbm [thread:$0]  (%p1394_p4), %s711_s3, 128, %s713_s30, %s682_s11   ;;  %v1047_v47 = vld [vmem:[%s1553_s7] ss:$0 sm:$0xff] }
 0x35f   : > { %s693_s17 = scalar_lea.hbm %s1554_s8, %s928_s27  ;;  %s431_s20 = scalar_lea.vmem [#allocation12], %s884_s18 }
 0x360   : > { %s695_s13 = sshll.u32 %s431_s20, 4  ;;  %s697_s21 = sshll.u32 %s693_s17, 4  ;;  %s696_s13 = int_to_ptr.vmem [resolvable:$true] %s695_s13  ;;  %s698_s21 = int_to_ptr.hbm [resolvable:$true] %s697_s21 }
 0x361   : > { %s677_s3 = scalar_lea.sflag [#allocation6], %s1476_s16  ;;  %s1214_s30 = sshra.s32 %s698_s21, 4  ;;  %s1215_s30 = int_to_ptr.hbm [resolvable:$true] %s1214_s30 }
 0x362   : > { %s1216_s11 = scalar_lea.hbm %s1215_s30, 8  ;;  %s1220_s18 = scalar_lea.hbm %s1554_s8, 16 }
 0x363   : > { %p1217_p10 = scmp.ne.s32.totalorder %s1215_s30, %s1216_s11  ;;  %p1221_p13 = scmp.lt.s32.totalorder %s1215_s30, %s1554_s8 }
 0x364   : > { %p1222_p0 = scmp.lt.s32.totalorder %s1220_s18, %s1216_s11 }
 0x365   : > { %p1218_p11 = pnand %p1217_p10, %p1394_p4 }
 0x366   : > { %p1223_p1 = por %p1222_p0, %p1221_p13 }
 0x367   : > { %p1219_p12 = pneg %p1218_p11 }
 0x369   : > { %p1224_p2 = pnand %p1223_p1, %p1219_p12 }
 0x3d8   : > { %v670_v48 = vpop.f32.mrf.mxu0 }
 0x3d9   : > { %v671_v49 = vadd.f32 %v1047_v47, %v670_v48 }
 0x3db   : > { %v674_v50 = vadd.f32 %v671_v49, %v1467_v4 }
 0x3dd   : > { %675 = vst.msk [vmem:[%s431_s20] sm:$0xff] %vm473_vm0, %v674_v50 }
 0x3de   : > { %1227 = shalt.err (!%p1224_p2)
}
 0x3df   : > { %956 = dma.vmem_to_hbm [thread:$0]  (%p1394_p4), %s696_s13, 128, %s698_s21, %s677_s3  }
 0x3e0   : > { %v672_v51 = vpop.f32.mrf.mxu0 }
 0x3e1 PF: > { %s1574_s16 = sld [smem:[#allocation20_spill]]  ;;  %p988_p3 = scmp.ge.s32.totalorder %s1294_s14, 2 }
 0x3e3   : > { %p974_p5 = pnand %p988_p3, %p1401_p8 }
 0x3e5   : > { %p975_p6 = pneg %p974_p5 }
 0x3e7   : > { %s724_s24 = sand.u32 1, %s1574_s16  }
 0x3e8   : > { %s725_s25 = scalar_lea.sflag [#allocation6], %s724_s24 }
 0x3e9   : > { %1265 = dma.done.wait (%p975_p6), %s725_s25, 128  }
 0x3ea   : > { %1267 = vsyncadd (%p975_p6), %s725_s25, 4294967168  ;;  %s735_s26 = scalar_lea.sflag [#allocation14], %s724_s24 }
 0x3eb   : > { %1269 = dma.done.wait (%p975_p6), %s735_s26, 128  }
 0x3ec   : > { %1271 = vsyncadd (%p975_p6), %s735_s26, 4294967168  ;;  %s29_s14 = sadd.s32 1, %s1294_s14   ;;  %s1576_s19 = sld [smem:[#allocation21_spill]] }
 0x3ed   : > { %p26_p7 = scmp.ge.s32.totalorder %s29_s14, 4   ;;  %s1577_s11 = sld [smem:[#allocation25_spill]] }
 0x3ee   : > { %s1578_s12 = sld [smem:[#allocation22_spill]]  ;;  %s1580_s30 = smov %s1278_s10 }
 0x3ef   : > { %s1579_s13 = sld [smem:[#allocation23_spill]]  ;;  %28 = sbr.rel (!%p26_p7) target bundleno = 11 (0xb), region = 128 }
 0x3f2   : > { %s1581_s10 = smov %s1576_s19 }
 0x3f4   :  { %741 = vsyncpa [#allocation5], 1 }
 0x3f5   :  { %743 = vsyncpa [#allocation5 + $0x1], 1 }
 0x3f6   :  { %744 = vsyncpa [#allocation8], 1 }
 0x3f7   :  { %745 = vsyncpa [#allocation11], 1 }
 0x3f8   :  { %746 = vsyncpa [#allocation6], 1 }
 0x3f9   :  { %748 = vsyncpa [#allocation6 + $0x1], 1 }
 0x3fa   :  { %749 = vsyncpa [#allocation14], 1 }
 0x3fb   :  { %751 = vsyncpa [#allocation14 + $0x1], 1 }

// kernel: tpu_custom_call.1
= control target key start
LH: loop header
LB: loop body
LE: loop exit
PB: predicated region body
PF: predicated region fallthrough
CT: control target
= control target key end

     0   :  { %s1546_s0 = inlined_call_operand.vmem [shape: f32[2,8,32], index: 0, kind: input, shape index: {}]   ;;  %s1547_s1 = inlined_call_operand.vmem [shape: f32[2,8,1], index: 1, kind: input, shape index: {}]   ;;  %s1548_s2 = inlined_call_operand.hbm [shape: bf16[32,64], index: 2, kind: input, shape index: {}]   ;;  %s1549_s3 = inlined_call_operand.hbm [shape: bf16[32,96], index: 3, kind: input, shape index: {}]   ;;  %s1550_s4 = inlined_call_operand.hbm [shape: bf16[32,32], index: 4, kind: input, shape index: {}]   ;;  %s1551_s5 = inlined_call_operand.vmem [shape: f32[1,32], index: 5, kind: input, shape index: {}]   ;;  %s1552_s6 = inlined_call_operand.hbm [shape: bf16[32,32], index: 6, kind: input, shape index: {}]   ;;  %s1553_s7 = inlined_call_operand.vmem [shape: f32[1,32], index: 7, kind: input, shape index: {}]   ;;  %s1554_s8 = inlined_call_operand.hbm [shape: f32[2,8,32], index: 8, kind: output, shape index: {0}]   ;;  %s1555_s9 = inlined_call_operand.hbm [shape: f32[2,8,8], index: 9, kind: output, shape index: {1}]  }
   0x1   :  { %1561 = sst [smem:[#allocation26_spill]] %s1549_s3 }
   0x2   :  { %15 = vsyncpa [#allocation5], 0 }
   0x3   :  { %16 = vsyncpa [#allocation8], 0 }
   0x4   :  { %17 = vsyncpa [#allocation11], 0 }
   0x5   :  { %18 = vsyncpa [#allocation6], 0 }
   0x6   :  { %20 = vsyncpa [#allocation6 + $0x1], 0 }
   0x7   :  { %21 = vsyncpa [#allocation14], 0 }
   0x8   :  { %23 = vsyncpa [#allocation14 + $0x1], 0  ;;  %s1354_s30 = smov 0   ;;  %s1356_s10 = smov 0  }
   0x9   :  { %s1358_s11 = smov 0   ;;  %s1360_s12 = smov 0  }
   0xa   :  { %s1362_s13 = smov 0   ;;  %s1364_s14 = smov 0  }
   0xb LB: > { %1562 = sst [smem:[#allocation20_spill]] %s1274_s30  ;;  %s871_s15 = sadd.s32 4294967295, %s1294_s14   ;;  %s1294_s14 = sphi %s1364_s14, %s29_s14   ;;  %s1290_s13 = sphi %s1362_s13, %s1579_s13   ;;  %s1286_s12 = sphi %s1360_s12, %s1578_s12   ;;  %s1282_s11 = sphi %s1358_s11, %s1577_s11   ;;  %s1278_s10 = sphi %s1356_s10, %s1581_s10   ;;  %s1274_s30 = sphi %s1354_s30, %s1580_s30  }
   0xc   : > { %1563 = sst [smem:[#allocation21_spill]] %s1282_s11  ;;  %s872_s16 = sadd.s32 4294967294, %s1294_s14  }
   0xd   : > { %1564 = sst [smem:[#allocation22_spill]] %s1290_s13  ;;  %s41_s17 = sadd.s32 1, %s1290_s13 }
   0xe   : > { %s230_s18 = sadd.s32 1, %s1282_s11  ;;  %p43_p0 = scmp.ge.s32.totalorder %s41_s17, 2 }
   0xf   : > { %p240_p1 = scmp.ne.s32.totalorder %s1282_s11, %s1278_s10  ;;  %p241_p2 = scmp.eq.s32.totalorder %s871_s15, 1 }
  0x10   : > { %p246_p3 = scmp.ne.s32.totalorder %s1278_s10, %s1274_s30  ;;  %s1583_s17 = smov (%p43_p0, %s41_s17), 0 }
  0x11   : > { %1565 = sst [smem:[#allocation23_spill]] %s1583_s17  ;;  %p1394_p4 = por %p241_p2, %p240_p1 }
  0x12   : > { %p247_p5 = scmp.eq.s32.totalorder %s872_s16, 1  ;;  %s225_s20 = ssub.s32 %s1290_s13, %s1583_s17 }
  0x13   : > { %p873_p6 = scmp.ge.s32.totalorder %s1294_s14, 1  ;;  %p228_p7 = scmp.eq.s32.totalorder %s225_s20, 0 }
  0x14   : > { %p1401_p8 = por %p247_p5, %p246_p3  ;;  %p282_p9 = scmp.lt.s32.totalorder %s1294_s14, 3 }
  0x15   : > { %s1407_s22 = scalar_select %p228_p7, %s1282_s11, %s230_s18  }
  0x16   : > { %s1567_s21 = scalar_select %p1401_p8, 1, 0 }
  0x17   : > { %1569 = sst [smem:[#allocation25_spill]] %s1407_s22  ;;  %p1409_p10 = pnand %p873_p6, %p282_p9 }
  0x18   : > { %1568 = sst [smem:[#allocation24_spill]] %s1567_s21  ;;  %p1413_p11 = scmp.eq.s32.totalorder %s871_s15, 0 }
  0x19   : > { %p960_p12 = pneg %p1409_p10  ;;  %s1572_s3 = sld [smem:[#allocation26_spill]] }
  0x1a   : > { %s1296_s29 = smov [#allocation7]   ;;  %s1297_s16 = smov 64  }
  0x1b   : > { %p1424_p13 = pnand %p1413_p11, %p960_p12  ;;  %s309_s15 = sshll.u32 %s1296_s29, 4  ;;  %s310_s15 = int_to_ptr.vmem [resolvable:$true] %s309_s15 }
  0x1c   : > { %s1298_s18 = smov 4   ;;  %s293_s25 = sshll.u32 %s1548_s2, 4  ;;  %s294_s25 = int_to_ptr.hbm [resolvable:$true] %s293_s25 }
  0x1d   : > { %s1299_s26 = smov [#allocation4]   ;;  %s321_s11 = sshll.u32 %s1550_s4, 4  ;;  %s322_s11 = int_to_ptr.hbm [resolvable:$true] %s321_s11 }
  0x1e   : > { %s1300_s29 = smov [#allocation9]   ;;  %s1301_s17 = smov [#allocation10]  }
  0x1f   : > { %s307_s27 = sshll.u32 %s1572_s3, 4  ;;  %s295_s3 = sshll.u32 %s1299_s26, 4  ;;  %s308_s27 = int_to_ptr.hbm [resolvable:$true] %s307_s27  ;;  %s296_s3 = int_to_ptr.vmem [resolvable:$true] %s295_s3 }
  0x20   : > { %966 = dma.hbm_to_vmem [thread:$0]  (!%p1424_p13), %s308_s27, 256, %s310_s15, [#allocation8], %s1297_s16, %s1297_s16, %s1298_s18  }
  0x21   : > { %963 = dma.hbm_to_vmem [thread:$0]  (!%p1424_p13), %s294_s25, 256, %s296_s3, [#allocation5], %s1297_s16, %s1297_s16, %s1298_s18  }
  0x22   : > { %s323_s21 = sshll.u32 %s1300_s29, 4  ;;  %s338_s15 = sshll.u32 %s1552_s6, 4  ;;  %s324_s21 = int_to_ptr.vmem [resolvable:$true] %s323_s21  ;;  %s339_s15 = int_to_ptr.hbm [resolvable:$true] %s338_s15 }
  0x23   : > { %969 = dma.hbm_to_vmem [thread:$0]  (!%p1424_p13), %s322_s11, 256, %s324_s21, [#allocation8], %s1297_s16, %s1297_s16, %s1298_s18  }
  0x24   : > { %s340_s20 = sshll.u32 %s1301_s17, 4  ;;  %376 = sbr.rel (%p1409_p10) target bundleno = 993 (0x3e1), region = 52  ;;  %s341_s20 = int_to_ptr.vmem [resolvable:$true] %s340_s20 }
  0x25   : > { %972 = dma.hbm_to_vmem [thread:$0]  (!%p1424_p13), %s339_s15, 256, %s341_s20, [#allocation11], %s1297_s16, %s1297_s16, %s1298_s18  }
  0x29   : > { %1253 = dma.done.wait (%p1413_p11), [#allocation5], 256  }
  0x2a   : > { %1255 = vsyncadd (%p1413_p11), [#allocation5], 4294967040 }
  0x2b   : > { %1257 = dma.done.wait (%p1413_p11), [#allocation8], 512  }
  0x2c   : > { %1259 = vsyncadd (%p1413_p11), [#allocation8], 4294966784 }
  0x2d   : > { %1261 = dma.done.wait (%p1413_p11), [#allocation11], 256  }
  0x2e   : > { %1263 = vsyncadd (%p1413_p11), [#allocation11], 4294967040  ;;  %p439_p0 = scmp.lt.s32.totalorder %s1286_s12, 1  ;;  %v1302_v0 = vmov 0   ;;  %v933_v1 = vld [vmem:[#allocation7 + $0x8] sm:$0xff]  ;;  %v935_v2 = vld [vmem:[#allocation4 + $0x8] sm:$0xff] }
  0x2f   : > { %1045 = vset.pattern.permute.xlu0 %v1302_v0  ;;  %v932_v3 = vld [vmem:[#allocation7] sm:$0xff]  ;;  %483 = vmatpush.bf16.msra.mxu0 %v933_v1  ;;  %v934_v6 = vld [vmem:[#allocation4] sm:$0xff]  ;;  %vm473_vm0 = vcmask 261120   ;;  %vm491_vm1 = vcmask 519168   ;;  %s1303_s24 = smov 64   ;;  %vm544_vm2 = vcmask 523264  }
  0x30   : > { %s440_s3 = scalar_select %p439_p0, %s1286_s12, 1  ;;  %527 = vmatpush.bf16.msra.mxu1 %v935_v2  ;;  %vm497_vm3 = vcmask 257024   ;;  %vm582_vm4 = vcmask 1043456   ;;  %vm564_vm5 = vcmask 64512   ;;  %v937_v30 = vld [vmem:[#allocation9 + $0x8] sm:$0xff]  ;;  %v936_v31 = vld [vmem:[#allocation9] sm:$0xff] }
  0x31   : > { %s1476_s16 = sand.u32 1, %s1278_s10   ;;  %v939_v36 = vld [vmem:[#allocation10 + $0x8] sm:$0xff]  ;;  %v938_v37 = vld [vmem:[#allocation10] sm:$0xff]  ;;  %s928_s27 = sshll.u32 %s1286_s12, 3 }
  0x32   : > { %s886_s30 = sshll.u32 %s440_s3, 3  ;;  %s884_s18 = sshll.u32 %s1476_s16, 3  ;;  %v1046_v41 = vld [vmem:[%s1551_s5] ss:$0 sm:$0xff] }
  0x33   : > { %s442_s21 = scalar_lea.vmem %s1546_s0, %s886_s30  ;;  %s449_s28 = scalar_lea.vmem %s1547_s1, %s886_s30  ;;  %484 = vmatpush.bf16.msra.mxu0 %v932_v3 }
  0x34   : > { %v1467_v4 = vld [vmem:[%s442_s21] sm:$0xff]  ;;  %528 = vmatpush.bf16.msra.mxu1 %v934_v6  ;;  %s438_s25 = scalar_lea.vmem [#allocation13], %s884_s18  ;;  %s708_s20 = scalar_lea.hbm %s1555_s9, %s928_s27 }
  0x35   : > { %v535_v5 = vld [vmem:[%s449_s28] sm:$0xff]  ;;  %v456_v7 = vpack.c.bf16 %v1467_v4, %v1467_v4  ;;  %s710_s3 = sshll.u32 %s438_s25, 4  ;;  %s712_s30 = sshll.u32 %s708_s20, 4  ;;  %s711_s3 = int_to_ptr.vmem [resolvable:$true] %s710_s3  ;;  %s713_s30 = int_to_ptr.hbm [resolvable:$true] %s712_s30 }
  0x36   : > { %538 = vperm.xlu0 %1045, %v535_v5   ;;  %s682_s11 = scalar_lea.sflag [#allocation14], %s1476_s16  ;;  %s1186_s13 = sshra.s32 %s713_s30, 4  ;;  %s1187_s13 = int_to_ptr.hbm [resolvable:$true] %s1186_s13 }
  0x37   : > { %896 = vmatmul.msk.bf16.vlgmr.msra.gmra.mxu0 %vm473_vm0, %v456_v7  ;;  %905 = vmatmul.msk.bf16.vlgmr.msra.gmra.mxu1 %vm473_vm0, %v456_v7  ;;  %s1188_s21 = scalar_lea.hbm %s1187_s13, 8  ;;  %s1192_s12 = scalar_lea.hbm %s1555_s9, 16 }
  0x38   : > { %667 = vmatpush.bf16.msrb.mxu0 %v939_v36  ;;  %p1189_p1 = scmp.ne.s32.totalorder %s1187_s13, %s1188_s21  ;;  %p1193_p5 = scmp.lt.s32.totalorder %s1187_s13, %s1555_s9 }
  0x39   : > { %p1194_p6 = scmp.lt.s32.totalorder %s1192_s12, %s1188_s21 }
  0x3a   : > { %p1190_p2 = pnand %p1189_p1, %p1394_p4 }
  0x3b   : > { %p1195_p7 = por %p1194_p6, %p1193_p5 }
  0x3c   : > { %668 = vmatpush.bf16.msrb.mxu0 %v938_v37  ;;  %p1191_p3 = pneg %p1190_p2 }
  0x3e   : > { %p1196_p9 = pnand %p1195_p7, %p1191_p3 }
  0xa8   : > { %v539_v12 = vpop.permute.xlu0 %538 }
  0xb4   : > { %v486_v8 = vpop.f32.mrf.mxu0  ;;  %v530_v9 = vpop.f32.mrf.mxu1 }
  0xb5   : > { %v490_v10 = vpack.c.bf16 %v486_v8, %v486_v8  ;;  %v534_v11 = vmul.f32 0.17677669, %v530_v9 }
  0xb7   : > { %492 = vst.msk [vmem:[#allocation2] sm:$0xf] %vm491_vm1, %v490_v10  ;;  %494 = vrot.lane.b32.xlu1 %v490_v10, %s1303_s24  ;;  %v541_v17 = vmul.f32 %v539_v12, %v534_v11 }
  0xb9   : > { %v542_v18 = vpack.c.bf16 %v541_v17, %v541_v17 }
  0xbc   : > { %v488_v13 = vpop.f32.mrf.mxu0  ;;  %v532_v14 = vpop.f32.mrf.mxu1 }
  0xbe   : > { %v543_v15 = vld [vmem:[#allocation2] sm:$0xf] }
  0xbf   : > { %v549_v16 = vsel %vm544_vm2, %v543_v15, 0 }
  0xc0   : > { %558 = vmatpush.bf16.xpose.msra.mxu2 %v549_v16 }
  0xc7   : > { %906 = vmatmul.msk.bf16.vlgmr.msra.gmra.mxu2 %vm544_vm2, %v542_v18 }
 0x129   : > { %v495_v19 = vpop.permute.xlu1 %494 }
 0x12a   : > { %498 = vst.msk [vmem:[#allocation3] sm:$0xf] %vm497_vm3, %v495_v19 }
 0x131   : > { %v578_v20 = vld [vmem:[#allocation3] sm:$0xf] }
 0x132   : > { %v584_v21 = vsel %vm582_vm4, %v578_v20, 0 }
 0x133   : > { %593 = vmatpush.bf16.msra.mxu3 %v584_v21 }
 0x137   : > { %629 = vmatpush.bf16.msrb.mxu3 %v937_v30 }
 0x13b   : > { %630 = vmatpush.bf16.msrb.mxu3 %v936_v31 }
 0x14a   : > { %v560_v22 = vpop.f32.mrf.mxu2 }
 0x14b   : > { %v565_v23 = vsel %vm564_vm5, %v560_v22, -inf }
 0x14c   : > { %566 = vmax.xlane.f32.xlu0 %v565_v23 }
 0x152   : > { %v562_v24 = vpop.f32.mrf.mxu2 }
 0x1bf   : > { %v567_v25 = vpop.xlane.xlu0 %566 }
 0x1c0   : > { %v568_v26 = vsub.f32 %v560_v22, %v567_v25 }
 0x1c2   : > { %v569_v27 = vmul.f32 1.442695, %v568_v26 }
 0x1c4   : > { %1048 = vpow2.f32 %v569_v27 }
 0x1ca   : > { %v1049_v28 = vpop.eup %1048 }
 0x1cb   : > { %v571_v29 = vsel %vm564_vm5, %v1049_v28, 0.0 }
 0x1cc   : > { %572 = vadd.xlane.f32.xlu1 %v571_v29 }
 0x23f   : > { %v573_v32 = vpop.xlane.xlu1 %572 }
 0x240   : > { %1050 = vrcp.f32 %v573_v32 }
 0x246   : > { %v1051_v33 = vpop.eup %1050 }
 0x247   : > { %v575_v34 = vmul.f32 %v1051_v33, %v1049_v28 }
 0x249   : > { %v577_v35 = vpack.c.bf16 %v575_v34, %v575_v34  ;;  %576 = vst.msk [vmem:[%s438_s25] sm:$0xff] %vm564_vm5, %v575_v34 }
 0x24b   : > { %907 = vmatmul.msk.bf16.vlgmr.msra.gmra.mxu3 %vm564_vm5, %v577_v35 }
 0x2ce   : > { %v595_v38 = vpop.f32.mrf.mxu3 }
 0x2cf   : > { %v599_v39 = vpack.c.bf16 %v595_v38, %v595_v38 }
 0x2d1   : > { %916 = vmatmul.msk.bf16.vlgmr.msrb.gmra.mxu3 %vm473_vm0, %v599_v39 }
 0x2d6   : > { %v597_v40 = vpop.f32.mrf.mxu3 }
 0x354   : > { %v632_v42 = vpop.f32.mrf.mxu3 }
 0x355   : > { %v633_v43 = vadd.f32 %v1046_v41, %v632_v42 }
 0x357   : > { %v636_v44 = vmax.f32 %v633_v43, 0.0 }
 0x359   : > { %v637_v45 = vpack.c.bf16 %v636_v44, %v636_v44 }
 0x35b   : > { %925 = vmatmul.msk.bf16.vlgmr.msrb.gmra.mxu0 %vm473_vm0, %v637_v45 }
 0x35c   : > { %v634_v46 = vpop.f32.mrf.mxu3 }
 0x35d   : > { %1199 = shalt.err (!%p1196_p9)
}
 0x35e   : > { %957 = dma.vmem_to_hbm [thread:$0]  (%p1394_p4), %s711_s3, 128, %s713_s30, %s682_s11   ;;  %v1047_v47 = vld [vmem:[%s1553_s7] ss:$0 sm:$0xff] }
 0x35f   : > { %s693_s17 = scalar_lea.hbm %s1554_s8, %s928_s27  ;;  %s431_s20 = scalar_lea.vmem [#allocation12], %s884_s18 }
 0x360   : > { %s695_s13 = sshll.u32 %s431_s20, 4  ;;  %s697_s21 = sshll.u32 %s693_s17, 4  ;;  %s696_s13 = int_to_ptr.vmem [resolvable:$true] %s695_s13  ;;  %s698_s21 = int_to_ptr.hbm [resolvable:$true] %s697_s21 }
 0x361   : > { %s677_s3 = scalar_lea.sflag [#allocation6], %s1476_s16  ;;  %s1214_s30 = sshra.s32 %s698_s21, 4  ;;  %s1215_s30 = int_to_ptr.hbm [resolvable:$true] %s1214_s30 }
 0x362   : > { %s1216_s11 = scalar_lea.hbm %s1215_s30, 8  ;;  %s1220_s18 = scalar_lea.hbm %s1554_s8, 16 }
 0x363   : > { %p1217_p10 = scmp.ne.s32.totalorder %s1215_s30, %s1216_s11  ;;  %p1221_p13 = scmp.lt.s32.totalorder %s1215_s30, %s1554_s8 }
 0x364   : > { %p1222_p0 = scmp.lt.s32.totalorder %s1220_s18, %s1216_s11 }
 0x365   : > { %p1218_p11 = pnand %p1217_p10, %p1394_p4 }
 0x366   : > { %p1223_p1 = por %p1222_p0, %p1221_p13 }
 0x367   : > { %p1219_p12 = pneg %p1218_p11 }
 0x369   : > { %p1224_p2 = pnand %p1223_p1, %p1219_p12 }
 0x3d8   : > { %v670_v48 = vpop.f32.mrf.mxu0 }
 0x3d9   : > { %v671_v49 = vadd.f32 %v1047_v47, %v670_v48 }
 0x3db   : > { %v674_v50 = vadd.f32 %v671_v49, %v1467_v4 }
 0x3dd   : > { %675 = vst.msk [vmem:[%s431_s20] sm:$0xff] %vm473_vm0, %v674_v50 }
 0x3de   : > { %1227 = shalt.err (!%p1224_p2)
}
 0x3df   : > { %956 = dma.vmem_to_hbm [thread:$0]  (%p1394_p4), %s696_s13, 128, %s698_s21, %s677_s3  }
 0x3e0   : > { %v672_v51 = vpop.f32.mrf.mxu0 }
 0x3e1 PF: > { %s1574_s16 = sld [smem:[#allocation20_spill]]  ;;  %p988_p3 = scmp.ge.s32.totalorder %s1294_s14, 2 }
 0x3e3   : > { %p974_p5 = pnand %p988_p3, %p1401_p8 }
 0x3e5   : > { %p975_p6 = pneg %p974_p5 }
 0x3e7   : > { %s724_s24 = sand.u32 1, %s1574_s16  }
 0x3e8   : > { %s725_s25 = scalar_lea.sflag [#allocation6], %s724_s24 }
 0x3e9   : > { %1265 = dma.done.wait (%p975_p6), %s725_s25, 128  }
 0x3ea   : > { %1267 = vsyncadd (%p975_p6), %s725_s25, 4294967168  ;;  %s735_s26 = scalar_lea.sflag [#allocation14], %s724_s24 }
 0x3eb   : > { %1269 = dma.done.wait (%p975_p6), %s735_s26, 128  }
 0x3ec   : > { %1271 = vsyncadd (%p975_p6), %s735_s26, 4294967168  ;;  %s29_s14 = sadd.s32 1, %s1294_s14   ;;  %s1576_s19 = sld [smem:[#allocation21_spill]] }
 0x3ed   : > { %p26_p7 = scmp.ge.s32.totalorder %s29_s14, 4   ;;  %s1577_s11 = sld [smem:[#allocation25_spill]] }
 0x3ee   : > { %s1578_s12 = sld [smem:[#allocation22_spill]]  ;;  %s1580_s30 = smov %s1278_s10 }
 0x3ef   : > { %s1579_s13 = sld [smem:[#allocation23_spill]]  ;;  %28 = sbr.rel (!%p26_p7) target bundleno = 11 (0xb), region = 128 }
 0x3f2   : > { %s1581_s10 = smov %s1576_s19 }
 0x3f4   :  { %741 = vsyncpa [#allocation5], 1 }
 0x3f5   :  { %743 = vsyncpa [#allocation5 + $0x1], 1 }
 0x3f6   :  { %744 = vsyncpa [#allocation8], 1 }
 0x3f7   :  { %745 = vsyncpa [#allocation11], 1 }
 0x3f8   :  { %746 = vsyncpa [#allocation6], 1 }
 0x3f9   :  { %748 = vsyncpa [#allocation6 + $0x1], 1 }
 0x3fa   :  { %749 = vsyncpa [#allocation14], 1 }
 0x3fb   :  { %751 = vsyncpa [#allocation14 + $0x1], 1 }

</bundles_post_ra>
